<compile_context>
chip_gen: v6e
topology: v6e:2x2x1
jax: 0.10.0
libtpu: 0.0.40
codegen_flags: <defaults>
</compile_context>

<pallas_src>
import jax
import jax.numpy as jnp
from jax.experimental import pallas as pl
from jax.experimental.pallas import tpu as pltpu


_LEAKY_SLOPE = 0.01  # nn.LeakyReLU default negative_slope


def _round_up(x, m):
    return (x + m - 1) // m * m


def _cdiv(a, b):
    return -(-a // b)


def _vmem_budget_bytes():
    """Per-generation usable VMEM budget (leave ~25% headroom for Mosaic scratch)."""
    try:
        cap = int(pltpu.get_tpu_info().vmem_capacity_bytes)
    except Exception:
        cap = 64 << 20  # conservative fallback (v7x per-TC VMEM)
    return (cap * 3) // 4


# ----------------------------- kernels -------------------------------------

def _ffn_resident_kernel(x_ref, w1_ref, b1_ref, w2_ref, b2_ref, o_ref):
    # w1/w2 fully resident in VMEM (constant index_map -> DMA'd once).
    # x_ref: [TILE_M, D]  w1: [D, H]  b1: [1, H]  w2: [H, D]  b2: [1, D]
    h = jnp.dot(x_ref[...], w1_ref[...], preferred_element_type=jnp.float32)
    h = h + b1_ref[...]
    h = jnp.where(h > 0, h, _LEAKY_SLOPE * h)
    # dropout == identity (eval mode)
    y = jnp.dot(h.astype(w2_ref.dtype), w2_ref[...],
                preferred_element_type=jnp.float32)
    o_ref[...] = (y + b2_ref[...]).astype(o_ref.dtype)


def _ffn_htiled_kernel(x_ref, w1_ref, b1_ref, w2_ref, b2_ref, o_ref, acc_ref):
    # Hidden dim tiled along grid axis 1 ("arbitrary") with f32 accumulator.
    h_idx = pl.program_id(1)

    @pl.when(h_idx == 0)
    def _():
        acc_ref[...] = jnp.zeros_like(acc_ref)

    h = jnp.dot(x_ref[...], w1_ref[...], preferred_element_type=jnp.float32)
    h = h + b1_ref[...]
    h = jnp.where(h > 0, h, _LEAKY_SLOPE * h)
    # dropout == identity (eval mode)

    acc_ref[...] += jnp.dot(h.astype(w2_ref.dtype), w2_ref[...],
                            preferred_element_type=jnp.float32)

    @pl.when(h_idx == pl.num_programs(1) - 1)
    def _():
        o_ref[...] = (acc_ref[...] + b2_ref[...]).astype(o_ref.dtype)


# ----------------------------- wrapper --------------------------------------

def prepare_ffn_params(w1, b1, w2, b2, compute_dtype=jnp.bfloat16):
    """One-time parameter prep (hoisted out of the hot path):
    pad D/H to lane-dense multiples of 128 and cast matmul weights."""
    D, H = w1.shape
    assert w2.shape == (H, D)
    D_pad, H_pad = _round_up(D, 128), _round_up(H, 128)
    w1p = jnp.zeros((D_pad, H_pad), compute_dtype).at[:D, :H].set(w1.astype(compute_dtype))
    w2p = jnp.zeros((H_pad, D_pad), compute_dtype).at[:H, :D].set(w2.astype(compute_dtype))
    b1p = jnp.zeros((1, H_pad), jnp.float32).at[0, :H].set(b1.astype(jnp.float32))
    b2p = jnp.zeros((1, D_pad), jnp.float32).at[0, :D].set(b2.astype(jnp.float32))
    return dict(w1=w1p, b1=b1p, w2=w2p, b2=b2p, d_model=D, hidden=H)


def feed_forward(x, params, *, tile_m_max=1024, force_h_tiled=False):
    """x: [B, S, d_model]; params from prepare_ffn_params (weights pre-transposed
    to [in_features, out_features] and padded/cast once)."""
    w1p, b1p, w2p, b2p = params["w1"], params["b1"], params["w2"], params["b2"]
    D = params["d_model"]
    B, S, _ = x.shape
    M = B * S
    compute_dtype = w1p.dtype
    out_dtype = x.dtype
    cbytes = jnp.dtype(compute_dtype).itemsize
    obytes = jnp.dtype(out_dtype).itemsize
    D_pad, H_pad = w1p.shape

    budget = _vmem_budget_bytes()

    # --- token (M) tiling: balanced tiles, >=2 so both v7x TensorCores get work ---
    m_align = 16 if compute_dtype == jnp.bfloat16 else 8
    num_m = _cdiv(M, tile_m_max)
    if num_m == 1 and M >= 2 * m_align:
        num_m = 2
    tile_budget = budget // 2  # leave at least half the budget for weights/slabs
    while True:
        tile_m = _round_up(_cdiv(M, num_m), m_align)
        per_tile = (2 * tile_m * D_pad * (cbytes + obytes)   # x + out (double-buffered)
                    + tile_m * D_pad * 4)                    # f32 accumulator (tiled path)
        if per_tile <= tile_budget or tile_m <= m_align:
            break
        num_m *= 2
    M_pad = num_m * tile_m

    # --- x reshape / cast; pad only when shapes are not already aligned ---
    x2d = x.reshape(M, D)
    if x2d.dtype != compute_dtype:
        x2d = x2d.astype(compute_dtype)
    if (M_pad, D_pad) != (M, D):
        x2d = jnp.pad(x2d, ((0, M_pad - M), (0, D_pad - D)))

    # --- path selection: weights resident in VMEM vs. H-tiled reduction ---
    weight_bytes = (2 * (D_pad * H_pad + H_pad * D_pad) * cbytes   # w1+w2 (2-buffer alloc)
                    + 2 * (H_pad + D_pad) * 4)                     # biases (f32)
    resident_need = weight_bytes + 2 * tile_m * D_pad * (cbytes + obytes)
    use_resident = (not force_h_tiled) and (resident_need <= budget)

    flops = 4 * M_pad * D_pad * H_pad

    if use_resident:
        grid = (num_m,)
        grid_spec = pltpu.PrefetchScalarGridSpec(
            num_scalar_prefetch=0,
            grid=grid,
            in_specs=[
                pl.BlockSpec((tile_m, D_pad), lambda i: (i, 0)),   # x tile
                pl.BlockSpec((D_pad, H_pad), lambda i: (0, 0)),    # w1 (resident, DMA'd once)
                pl.BlockSpec((1, H_pad), lambda i: (0, 0)),        # b1
                pl.BlockSpec((H_pad, D_pad), lambda i: (0, 0)),    # w2 (resident, DMA'd once)
                pl.BlockSpec((1, D_pad), lambda i: (0, 0)),        # b2
            ],
            out_specs=pl.BlockSpec((tile_m, D_pad), lambda i: (i, 0)),
            scratch_shapes=[],
        )
        kernel = _ffn_resident_kernel
        semantics = ("parallel",)
        need = resident_need
        bytes_accessed = (M_pad * D_pad * (cbytes + obytes)          # x + out
                          + (D_pad * H_pad + H_pad * D_pad) * cbytes  # weights once
                          + (H_pad + D_pad) * 4)
    else:
        # Largest hidden slab that fits the remaining budget (Buffered(3) weight slabs).
        tile_h = 128
        for cand in (2048, 1024, 512, 256, 128):
            if H_pad % cand:
                continue
            slab = 3 * 2 * D_pad * cand * cbytes + 2 * (cand + D_pad) * 4
            if slab + per_tile <= budget:
                tile_h = cand
                break
        slab_bytes = 3 * 2 * D_pad * tile_h * cbytes + 2 * (tile_h + D_pad) * 4
        need = slab_bytes + per_tile
        num_h = H_pad // tile_h
        grid = (num_m, num_h)
        grid_spec = pltpu.PrefetchScalarGridSpec(
            num_scalar_prefetch=0,
            grid=grid,
            in_specs=[
                pl.BlockSpec((tile_m, D_pad), lambda i, h: (i, 0)),            # x tile
                pl.BlockSpec((D_pad, tile_h), lambda i, h: (0, h),
                             pipeline_mode=pl.Buffered(3)),                    # w1 slab
                pl.BlockSpec((1, tile_h), lambda i, h: (0, h)),                # b1 slab
                pl.BlockSpec((tile_h, D_pad), lambda i, h: (h, 0),
                             pipeline_mode=pl.Buffered(3)),                    # w2 slab
                pl.BlockSpec((1, D_pad), lambda i, h: (0, 0)),                 # b2
            ],
            out_specs=pl.BlockSpec((tile_m, D_pad), lambda i, h: (i, 0)),
            scratch_shapes=[pltpu.VMEM((tile_m, D_pad), jnp.float32)],
        )
        kernel = _ffn_htiled_kernel
        semantics = ("parallel", "arbitrary")
        # Weights are re-streamed once per M tile under this path.
        bytes_accessed = (M_pad * D_pad * (cbytes + obytes)
                          + num_m * (D_pad * H_pad + H_pad * D_pad) * cbytes
                          + num_m * (H_pad + D_pad) * 4)

    vmem_limit = int(min(max(need + (4 << 20), 16 << 20), max(budget, need)))

    out2d = pl.pallas_call(
        kernel,
        out_shape=jax.ShapeDtypeStruct((M_pad, D_pad), out_dtype),
        grid_spec=grid_spec,
        compiler_params=pltpu.CompilerParams(
            dimension_semantics=semantics,
            vmem_limit_bytes=vmem_limit,
        ),
        cost_estimate=pl.CostEstimate(flops=flops, transcendentals=0,
                                      bytes_accessed=int(bytes_accessed)),
    )(x2d, w1p, b1p, w2p, b2p)

    if (M_pad, D_pad) != (M, D):
        out2d = out2d[:M, :D]
    return out2d.reshape(B, S, D)


def _reference(x, w1, b1, w2, b2):
    h = jnp.dot(x, w1) + b1
    h = jnp.where(h > 0, h, _LEAKY_SLOPE * h)
    return jnp.dot(h, w2) + b2


if __name__ == "__main__":
    # Small shapes consistent with the module: batch=2, seq=8, d_model=32, hidden=64.
    B, S, D, H = 2, 8, 32, 64
    key = jax.random.PRNGKey(0)
    kx, k1, k2, k3, k4, k5, k6, k7, k8 = jax.random.split(key, 9)

    x = jax.random.normal(kx, (B, S, D), dtype=jnp.float32)

    # Deterministic parameter init (uniform, PyTorch-Linear-style bounds),
    # stored pre-transposed: [in_features, out_features].
    bound1 = 1.0 / (D ** 0.5)
    bound2 = 1.0 / (H ** 0.5)
    w1 = jax.random.uniform(k1, (D, H), jnp.float32, -bound1, bound1)
    b1 = jax.random.uniform(k2, (H,), jnp.float32, -bound1, bound1)
    w2 = jax.random.uniform(k3, (H, D), jnp.float32, -bound2, bound2)
    b2 = jax.random.uniform(k4, (D,), jnp.float32, -bound2, bound2)

    params = prepare_ffn_params(w1, b1, w2, b2)           # one-time prep (hoisted)
    ref = _reference(x, w1, b1, w2, b2)

    # 1) Weights-resident fast path (chosen automatically at these sizes).
    out = jax.block_until_ready(feed_forward(x, params))
    assert out.shape == (B, S, D)
    # bf16 matmuls (f32 accumulate) vs f32 reference -> relaxed tolerance.
    assert jnp.allclose(out, ref, atol=5e-2, rtol=5e-2), "resident path mismatch"

    # 2) H-tiled reduction fallback, exercised explicitly with a hidden dim that
    #    needs multiple reduction steps (H2=320 -> H_pad=384 -> 3 x tile_h=128).
    H2 = 320
    bound2b = 1.0 / (H2 ** 0.5)
    w1b = jax.random.uniform(k5, (D, H2), jnp.float32, -bound1, bound1)
    b1b = jax.random.uniform(k6, (H2,), jnp.float32, -bound1, bound1)
    w2b = jax.random.uniform(k7, (H2, D), jnp.float32, -bound2b, bound2b)
    b2b = jax.random.uniform(k8, (D,), jnp.float32, -bound2b, bound2b)
    params_b = prepare_ffn_params(w1b, b1b, w2b, b2b)
    ref_b = _reference(x, w1b, b1b, w2b, b2b)

    out_b = jax.block_until_ready(feed_forward(x, params_b, force_h_tiled=True))
    assert out_b.shape == (B, S, D)
    assert jnp.allclose(out_b, ref_b, atol=5e-2, rtol=5e-2), "h-tiled path mismatch"

    print("KERNEL_OK")
</pallas_src>

<mosaic_0001>
module attributes {stable_mosaic.version = 11 : i64} {
  func.func @_ffn_resident_kernel(%arg0: i32, %arg1: memref<16x128xbf16, #tpu.memory_space<vmem>>, %arg2: memref<128x128xbf16, #tpu.memory_space<vmem>>, %arg3: memref<1x128xf32, #tpu.memory_space<vmem>>, %arg4: memref<128x128xbf16, #tpu.memory_space<vmem>>, %arg5: memref<1x128xf32, #tpu.memory_space<vmem>>, %arg6: memref<16x128xf32, #tpu.memory_space<vmem>>) attributes {dimension_semantics = [#tpu.dimension_semantics<parallel>], iteration_bounds = array<i64: 1>, scalar_prefetch = 0 : i64, scratch_operands = 0 : i64, tpu.core_type = #tpu.core_type<tc>, window_params = [{transform_indices = @transform_0, window_bounds = array<i64: 16, 128>}, {pipeline_mode = #tpu.pipeline_mode<synchronous>, transform_indices = @transform_1, window_bounds = array<i64: 128, 128>}, {pipeline_mode = #tpu.pipeline_mode<synchronous>, transform_indices = @transform_2, window_bounds = array<i64: 1, 128>}, {pipeline_mode = #tpu.pipeline_mode<synchronous>, transform_indices = @transform_3, window_bounds = array<i64: 128, 128>}, {pipeline_mode = #tpu.pipeline_mode<synchronous>, transform_indices = @transform_4, window_bounds = array<i64: 1, 128>}, {transform_indices = @transform_5, window_bounds = array<i64: 16, 128>}]} {
    %c0 = arith.constant 0 : index
    %c0_0 = arith.constant 0 : index
    %0 = vector.load %arg1[%c0, %c0_0] : memref<16x128xbf16, #tpu.memory_space<vmem>>, vector<16x128xbf16>
    %c0_1 = arith.constant 0 : index
    %c0_2 = arith.constant 0 : index
    %1 = vector.load %arg2[%c0_1, %c0_2] : memref<128x128xbf16, #tpu.memory_space<vmem>>, vector<128x128xbf16>
    %cst = arith.constant dense<0.000000e+00> : vector<16x128xf32>
    %2 = tpu.matmul %0, %1, %cst {dimension_numbers = #tpu.dot_dimension_numbers<[1], [0], [0], [1], [0, 0, 1, 1], [], []>} : vector<16x128xbf16>, vector<128x128xbf16>, vector<16x128xf32> -> vector<16x128xf32>
    %c0_3 = arith.constant 0 : index
    %c0_4 = arith.constant 0 : index
    %3 = vector.load %arg3[%c0_3, %c0_4] : memref<1x128xf32, #tpu.memory_space<vmem>>, vector<1x128xf32>
    %4 = vector.broadcast %3 : vector<1x128xf32> to vector<16x128xf32>
    %5 = arith.addf %2, %4 : vector<16x128xf32>
    %cst_5 = arith.constant 0.000000e+00 : f32
    %6 = vector.broadcast %cst_5 : f32 to vector<16x128xf32>
    %7 = arith.cmpf ogt, %5, %6 : vector<16x128xf32>
    %cst_6 = arith.constant 0.00999999977 : f32
    %8 = vector.broadcast %cst_6 : f32 to vector<16x128xf32>
    %9 = arith.mulf %8, %5 : vector<16x128xf32>
    %10 = arith.select %7, %5, %9 : vector<16x128xi1>, vector<16x128xf32>
    %11 = arith.truncf %10 : vector<16x128xf32> to vector<16x128xbf16>
    %c0_7 = arith.constant 0 : index
    %c0_8 = arith.constant 0 : index
    %12 = vector.load %arg4[%c0_7, %c0_8] : memref<128x128xbf16, #tpu.memory_space<vmem>>, vector<128x128xbf16>
    %cst_9 = arith.constant dense<0.000000e+00> : vector<16x128xf32>
    %13 = tpu.matmul %11, %12, %cst_9 {dimension_numbers = #tpu.dot_dimension_numbers<[1], [0], [0], [1], [0, 0, 1, 1], [], []>} : vector<16x128xbf16>, vector<128x128xbf16>, vector<16x128xf32> -> vector<16x128xf32>
    %c0_10 = arith.constant 0 : index
    %c0_11 = arith.constant 0 : index
    %14 = vector.load %arg5[%c0_10, %c0_11] : memref<1x128xf32, #tpu.memory_space<vmem>>, vector<1x128xf32>
    %15 = vector.broadcast %14 : vector<1x128xf32> to vector<16x128xf32>
    %16 = arith.addf %13, %15 : vector<16x128xf32>
    %c0_12 = arith.constant 0 : index
    %c0_13 = arith.constant 0 : index
    %17 = vector.load %arg6[%c0_12, %c0_13] : memref<16x128xf32, #tpu.memory_space<vmem>>, vector<16x128xf32>
    tpu.vector_store %arg6[%c0_12, %c0_13], %16 {strides = array<i32>} : memref<16x128xf32, #tpu.memory_space<vmem>>, vector<16x128xf32>,
    return
  }
  func.func @transform_0(%arg0: i32) -> (i32, i32) {
    %c0_i32 = arith.constant 0 : i32
    %c0_i32_0 = arith.constant 0 : i32
    return %arg0, %c0_i32 : i32, i32
  }
  func.func @transform_1(%arg0: i32) -> (i32, i32) {
    %c0_i32 = arith.constant 0 : i32
    %c0_i32_0 = arith.constant 0 : i32
    %c0_i32_1 = arith.constant 0 : i32
    return %c0_i32, %c0_i32_0 : i32, i32
  }
  func.func @transform_2(%arg0: i32) -> (i32, i32) {
    %c0_i32 = arith.constant 0 : i32
    %c0_i32_0 = arith.constant 0 : i32
    %c0_i32_1 = arith.constant 0 : i32
    return %c0_i32, %c0_i32_0 : i32, i32
  }
  func.func @transform_3(%arg0: i32) -> (i32, i32) {
    %c0_i32 = arith.constant 0 : i32
    %c0_i32_0 = arith.constant 0 : i32
    %c0_i32_1 = arith.constant 0 : i32
    return %c0_i32, %c0_i32_0 : i32, i32
  }
  func.func @transform_4(%arg0: i32) -> (i32, i32) {
    %c0_i32 = arith.constant 0 : i32
    %c0_i32_0 = arith.constant 0 : i32
    %c0_i32_1 = arith.constant 0 : i32
    return %c0_i32, %c0_i32_0 : i32, i32
  }
  func.func @transform_5(%arg0: i32) -> (i32, i32) {
    %c0_i32 = arith.constant 0 : i32
    %c0_i32_0 = arith.constant 0 : i32
    return %arg0, %c0_i32 : i32, i32
  }
}

</mosaic_0001>

<bundles_post_ra>
// kernel: tpu_custom_call.1
= control target key start
LH: loop header
LB: loop body
LE: loop exit
PB: predicated region body
PF: predicated region fallthrough
CT: control target
= control target key end

     0   :  { %10 = vsyncpa [#allocation3], 0  ;;  %s570_s0 = inlined_call_operand.hbm [shape: bf16[16,128], index: 0, kind: input, shape index: {}]   ;;  %s571_s1 = inlined_call_operand.hbm [shape: bf16[128,128], index: 1, kind: input, shape index: {}]   ;;  %s572_s2 = inlined_call_operand.vmem [shape: f32[1,128], index: 2, kind: input, shape index: {}]   ;;  %s573_s3 = inlined_call_operand.hbm [shape: bf16[128,128], index: 3, kind: input, shape index: {}]   ;;  %s574_s4 = inlined_call_operand.vmem [shape: f32[1,128], index: 4, kind: input, shape index: {}]   ;;  %s575_s5 = inlined_call_operand.hbm [shape: f32[16,128], index: 5, kind: output, shape index: {}]  }
   0x1   :  { %11 = vsyncpa [#allocation6], 0 }
   0x2   :  { %12 = vsyncpa [#allocation4], 0  ;;  %s512_s18 = smov [#allocation5]   ;;  %s513_s20 = smov [#allocation2]  }
   0x3   :  { %s30_s19 = sshll.u32 %s512_s18, 4  ;;  %s18_s21 = sshll.u32 %s513_s20, 4  ;;  %s31_s19 = int_to_ptr.vmem [resolvable:$true] %s30_s19  ;;  %s19_s21 = int_to_ptr.vmem [resolvable:$true] %s18_s21 }
   0x4   :  { %s434_s22 = scalar_lea.vmem %s31_s19, 1024  ;;  %p439_p1 = scmp.lt.s32.totalorder %s31_s19, %s31_s19 }
   0x5   :  { %p435_p0 = scmp.ne.s32.totalorder %s31_s19, %s434_s22  ;;  %p440_p2 = scmp.lt.s32.totalorder %s434_s22, %s434_s22 }
   0x7   :  { %p441_p3 = por %p440_p2, %p439_p1 }
   0x9   :  { %p442_p4 = pnand %p441_p3, %p435_p0 }
   0xb   :  { %445 = shalt.err (!%p442_p4)
}
   0xc   :  { %s514_s23 = smov 64   ;;  %s515_s24 = smov 4  }
   0xd   :  { %36 = dma.hbm_to_vmem [thread:$0]  %s571_s1, 1024, %s31_s19, [#allocation6], %s514_s23, %s514_s23, %s515_s24  }
   0xe   :  { %s454_s27 = scalar_lea.vmem %s19_s21, 128  ;;  %p459_p6 = scmp.lt.s32.totalorder %s19_s21, %s19_s21 }
   0xf   :  { %p455_p5 = scmp.ne.s32.totalorder %s19_s21, %s454_s27  ;;  %p460_p7 = scmp.lt.s32.totalorder %s454_s27, %s454_s27 }
  0x11   :  { %p461_p8 = por %p460_p7, %p459_p6 }
  0x13   :  { %p462_p9 = pnand %p461_p8, %p455_p5 }
  0x15   :  { %465 = shalt.err (!%p462_p9)
}
  0x16   :  { %24 = dma.hbm_to_vmem [thread:$0]  %s570_s0, 128, %s19_s21, [#allocation3], %s514_s23, %s514_s23, %s515_s24  }
  0x17   :  { %s516_s30 = smov [#allocation7]  }
  0x18   :  { %s44_s6 = sshll.u32 %s516_s30, 4  ;;  %s45_s6 = int_to_ptr.vmem [resolvable:$true] %s44_s6 }
  0x19   :  { %s474_s7 = scalar_lea.vmem %s45_s6, 1024  ;;  %p479_p11 = scmp.lt.s32.totalorder %s45_s6, %s45_s6 }
  0x1a   :  { %p475_p10 = scmp.ne.s32.totalorder %s45_s6, %s474_s7  ;;  %p480_p12 = scmp.lt.s32.totalorder %s474_s7, %s474_s7 }
  0x1c   :  { %p481_p13 = por %p480_p12, %p479_p11 }
  0x1e   :  { %p482_p0 = pnand %p481_p13, %p475_p10 }
  0x20   :  { %485 = shalt.err (!%p482_p0)
}
  0x21   :  { %50 = dma.hbm_to_vmem [thread:$0]  %s573_s3, 1024, %s45_s6, [#allocation6], %s514_s23, %s514_s23, %s515_s24  }
  0x22   :  { %506 = dma.done.wait [#allocation3], 128  }
  0x23   :  { %507 = vsyncadd [#allocation3], 4294967168 }
  0x24   :  { %508 = dma.done.wait [#allocation6], 2048  }
  0x25   :  { %509 = vsyncadd [#allocation6], 4294965248  ;;  %v517_v0 = vmov 0.0   ;;  %vm518_vm0 = vmmov 0   ;;  %v409_v1 = vld [vmem:[#allocation5 + $0x38] sm:$0xff]   ;;  %v410_v2 = vld [vmem:[#allocation5 + $0x30] sm:$0xff]  }
  0x26   :  { %359 = vmatprep.subr.bf16.mxu0 %v517_v0  ;;  %375 = vmatprep.mubr.msk.bf16.mxu0 %vm518_vm0, %v517_v0  ;;  %v411_v3 = vld [vmem:[#allocation5 + $0x28] sm:$0xff]   ;;  %v418_v4 = vld [vmem:[#allocation7 + $0x38] sm:$0xff]   ;;  %v412_v5 = vld [vmem:[#allocation5 + $0x20] sm:$0xff]  }
  0x27   :  { %379 = vmatprep.subr.bf16.mxu1 %v517_v0  ;;  %395 = vmatprep.mubr.msk.bf16.mxu1 %vm518_vm0, %v517_v0  ;;  %v419_v6 = vld [vmem:[#allocation7 + $0x30] sm:$0xff]   ;;  %v413_v7 = vld [vmem:[#allocation5 + $0x18] sm:$0xff]   ;;  %v420_v8 = vld [vmem:[#allocation7 + $0x28] sm:$0xff]  }
  0x28   :  { %360 = vmatpush3.bf16.msra.mxu0 %v409_v1  ;;  %380 = vmatpush3.bf16.msra.mxu1 %v418_v4  ;;  %v414_v9 = vld [vmem:[#allocation5 + $0x10] sm:$0xff]   ;;  %v421_v10 = vld [vmem:[#allocation7 + $0x20] sm:$0xff]   ;;  %v415_v11 = vld [vmem:[#allocation5 + $0x8] sm:$0xff]  }
  0x29   :  { %361 = vmatprep.subr.bf16.mxu0 %v517_v0  ;;  %381 = vmatprep.subr.bf16.mxu1 %v517_v0  ;;  %v422_v12 = vld [vmem:[#allocation7 + $0x18] sm:$0xff]   ;;  %v416_v13 = vld [vmem:[#allocation5] sm:$0xff]   ;;  %v423_v15 = vld [vmem:[#allocation7 + $0x10] sm:$0xff]  }
  0x2a   :  { %v417_v14 = vld [vmem:[#allocation2] sm:$0xff]   ;;  %v424_v16 = vld [vmem:[#allocation7 + $0x8] sm:$0xff]   ;;  %v425_v17 = vld [vmem:[#allocation7] sm:$0xff]  }
  0x2b   :  { %v322_v18 = vld [vmem:[%s572_s2] ss:$0 sm:$0xff]  ;;  %s519_s2 = smov [#allocation8]  }
  0x2c   :  { %362 = vmatpush3.bf16.msra.mxu0 %v410_v2  ;;  %382 = vmatpush3.bf16.msra.mxu1 %v419_v6  ;;  %v332_v30 = vld [vmem:[%s574_s4] ss:$0 sm:$0xff]  ;;  %s309_s11 = sshll.u32 %s519_s2, 4  ;;  %s310_s11 = int_to_ptr.vmem [resolvable:$true] %s309_s11 }
  0x2d   :  { %363 = vmatprep.subr.bf16.mxu0 %v517_v0  ;;  %383 = vmatprep.subr.bf16.mxu1 %v517_v0  ;;  %s486_s12 = scalar_lea.vmem %s310_s11, 256  ;;  %p491_p2 = scmp.lt.s32.totalorder %s310_s11, %s310_s11 }
  0x2e   :  { %p487_p1 = scmp.ne.s32.totalorder %s310_s11, %s486_s12  ;;  %p492_p3 = scmp.lt.s32.totalorder %s486_s12, %s486_s12 }
  0x30   :  { %364 = vmatpush3.bf16.msra.mxu0 %v411_v3  ;;  %384 = vmatpush3.bf16.msra.mxu1 %v420_v8  ;;  %p493_p4 = por %p492_p3, %p491_p2 }
  0x31   :  { %365 = vmatprep.subr.bf16.mxu0 %v517_v0  ;;  %385 = vmatprep.subr.bf16.mxu1 %v517_v0 }
  0x32   :  { %p494_p5 = pnand %p493_p4, %p487_p1 }
  0x34   :  { %366 = vmatpush3.bf16.msra.mxu0 %v412_v5  ;;  %386 = vmatpush3.bf16.msra.mxu1 %v421_v10 }
  0x35   :  { %367 = vmatprep.subr.bf16.mxu0 %v517_v0  ;;  %387 = vmatprep.subr.bf16.mxu1 %v517_v0 }
  0x38   :  { %368 = vmatpush3.bf16.msra.mxu0 %v413_v7  ;;  %388 = vmatpush3.bf16.msra.mxu1 %v422_v12 }
  0x39   :  { %369 = vmatprep.subr.bf16.mxu0 %v517_v0  ;;  %389 = vmatprep.subr.bf16.mxu1 %v517_v0 }
  0x3c   :  { %370 = vmatpush3.bf16.msra.mxu0 %v414_v9  ;;  %390 = vmatpush3.bf16.msra.mxu1 %v423_v15 }
  0x3d   :  { %371 = vmatprep.subr.bf16.mxu0 %v517_v0  ;;  %391 = vmatprep.subr.bf16.mxu1 %v517_v0 }
  0x40   :  { %372 = vmatpush3.bf16.msra.mxu0 %v415_v11  ;;  %392 = vmatpush3.bf16.msra.mxu1 %v424_v16 }
  0x41   :  { %373 = vmatprep.subr.bf16.mxu0 %v517_v0  ;;  %393 = vmatprep.subr.bf16.mxu1 %v517_v0 }
  0x44   :  { %374 = vmatpush3.bf16.msra.mxu0 %v416_v13  ;;  %394 = vmatpush3.bf16.msra.mxu1 %v425_v17 }
  0x47   :  { %376 = vmatmul.mubr.bf16.vlgmr.msra.gmra.mxu0 %v417_v14 }
 0x107   :  { %v176_v19 = vpop.f32.mrf.mxu0 }
 0x108   :  { %v177_v20 = vadd.f32 %v322_v18, %v176_v19 }
 0x109   :  { %v377_v21 = vpop.f32.mrf.mxu0 }
 0x10a   :  { %v185_v23 = vmul.f32 0.01, %v177_v20  ;;  %vm183_vm1 = vcmp.gt.f32.partialorder %v177_v20, 0.0 }
 0x10b   :  { %v179_v22 = vpop.f32.mrf.mxu0 }
 0x10c   :  { %v180_v24 = vadd.f32 %v322_v18, %v179_v22  ;;  %v187_v27 = vsel %vm183_vm1, %v177_v20, %v185_v23 }
 0x10d   :  { %v378_v25 = vpop.f32.mrf.mxu0 }
 0x10e   :  { %vm184_vm2 = vcmp.gt.f32.partialorder %v180_v24, 0.0  ;;  %v186_v26 = vmul.f32 0.01, %v180_v24 }
 0x110   :  { %v188_v28 = vsel %vm184_vm2, %v180_v24, %v186_v26 }
 0x111   :  { %v189_v29 = vpack.c.bf16 %v188_v28, %v187_v27 }
 0x113   :  { %396 = vmatmul.mubr.bf16.vlgmr.msra.gmra.mxu1 %v189_v29 }
 0x1d3   :  { %v295_v31 = vpop.f32.mrf.mxu1 }
 0x1d4   :  { %v296_v32 = vadd.f32 %v332_v30, %v295_v31 }
 0x1d5   :  { %v397_v33 = vpop.f32.mrf.mxu1 }
 0x1d6   :  { %302 = vst [vmem:[#allocation8] sm:$0xff] %v296_v32 }
 0x1d7   :  { %v298_v34 = vpop.f32.mrf.mxu1 }
 0x1d8   :  { %v299_v35 = vadd.f32 %v332_v30, %v298_v34 }
 0x1d9   :  { %v398_v36 = vpop.f32.mrf.mxu1 }
 0x1da   :  { %303 = vst [vmem:[#allocation8 + $0x8] sm:$0xff] %v299_v35 }
 0x1db   :  { %497 = shalt.err (!%p494_p5)
}
 0x1dc   :  { %s520_s13 = smov 128   ;;  %s521_s4 = smov 8  }
 0x1dd   :  { %315 = dma.vmem_to_hbm [thread:$0]  %s310_s11, 256, %s575_s5, [#allocation4], %s520_s13, %s520_s13, %s521_s4  }
 0x1de   :  { %510 = dma.done.wait [#allocation4], 256  }
 0x1df   :  { %511 = vsyncadd [#allocation4], 4294967040 }
 0x1e0   :  { %319 = vsyncpa [#allocation3], 1 }
 0x1e1   :  { %320 = vsyncpa [#allocation6], 1 }
 0x1e2   :  { %321 = vsyncpa [#allocation4], 1 }

</bundles_post_ra>
